<compile_context>
chip_gen: v7x
topology: tpu7x:2x2x1
jax: 0.10.0
libtpu: 0.0.40
codegen_flags: <defaults>
</compile_context>

<pallas_src>
import numpy as np

import jax
import jax.numpy as jnp
from jax.experimental import pallas as pl
from jax.experimental.pallas import tpu as pltpu


def _round_up(n, m):
    return ((n + m - 1) // m) * m


def attack_kernel(xt_ref, w1_ref, b1_ref, w2_ref, b2_ref, ot_ref):
    """One batch tile; everything transposed so the batch axis is the lane axis.

    xt_ref: (K, TB)  f32   x^T tile              (K = clip = 3)
    w1_ref: (H, K)   f32   fc1 weight, torch (out, in) layout (H = 64)
    b1_ref: (H, 1)   f32
    w2_ref: (N, H)   f32   fc4 weight, torch (out, in) layout (N = 2)
    b2_ref: (N, 1)   f32
    ot_ref: (N, TB)  f32   out^T tile (lane-dense store)
    """
    xt = xt_ref[...]                       # (K, TB)
    w1 = w1_ref[...]                       # (H, K)
    K = xt_ref.shape[0]

    # fc1 as K broadcast FMAs on the VPU: h^T[h, b] = sum_k w1[h, k] * x^T[k, b].
    h = w1[:, 0:1] * xt[0:1, :]            # (H, TB)
    for k in range(1, K):
        h = h + w1[:, k:k + 1] * xt[k:k + 1, :]
    h = jnp.maximum(h + b1_ref[...], 0.0)  # bias + ReLU, exact f32

    # fc4 on the MXU: (N, H) @ (H, TB), f32 accumulate. Lane-dense (N, TB) result.
    o = jnp.dot(w2_ref[...], h, preferred_element_type=jnp.float32)
    ot_ref[...] = (o + b2_ref[...]).astype(ot_ref.dtype)


def attack_forward(x, w1, b1, w2, b2, *, block_rows=8192, vmem_limit_bytes=None):
    """Forward pass of `attack`.

    x:  (B, clip) float32
    w1: (64, clip), b1: (64,), w2: (2, 64), b2: (2,)  -- torch nn.Linear layouts.
    Returns (B, 2) float32 == fc4(relu(fc1(x))).
    """
    B, K = x.shape
    H, Kw = w1.shape
    N = w2.shape[0]
    assert Kw == K and w2.shape[1] == H and b1.shape == (H,) and b2.shape == (N,)

    # Batch (lane-axis) tile: multiple of 128, capped by block_rows and by B.
    block_rows = max(128, _round_up(block_rows, 128))  # defensive vs. (8,128) rule
    TB = min(block_rows, _round_up(B, 128))
    num_tiles = pl.cdiv(B, TB)
    Bp = num_tiles * TB

    # The transpose is required by the lane-dense layout; the batch pad is folded
    # into the same wrapper copy (x is only 12 B/row, so this pass is negligible).
    xt = jnp.zeros((K, Bp), jnp.float32).at[:, :B].set(x.astype(jnp.float32).T)

    w1f = w1.astype(jnp.float32)
    w2f = w2.astype(jnp.float32)
    b1c = b1.reshape(H, 1).astype(jnp.float32)
    b2c = b2.reshape(N, 1).astype(jnp.float32)

    out_t = pl.pallas_call(
        attack_kernel,
        out_shape=jax.ShapeDtypeStruct((N, Bp), jnp.float32),
        grid=(num_tiles,),
        in_specs=[
            pl.BlockSpec((K, TB), lambda i: (0, i)),   # x^T: tiled over batch lanes
            pl.BlockSpec((H, K), lambda i: (0, 0)),    # w1: VMEM-resident
            pl.BlockSpec((H, 1), lambda i: (0, 0)),    # b1: resident
            pl.BlockSpec((N, H), lambda i: (0, 0)),    # w2: resident
            pl.BlockSpec((N, 1), lambda i: (0, 0)),    # b2: resident
        ],
        out_specs=pl.BlockSpec((N, TB), lambda i: (0, i)),  # lane-dense out^T tile
        compiler_params=pltpu.CompilerParams(
            dimension_semantics=("parallel",),   # megacore split over batch tiles
            vmem_limit_bytes=vmem_limit_bytes,   # set when pushing TB >= ~16384
        ),
    )(xt, w1f, b1c, w2f, b2c)

    return out_t[:, :B].T


def init_params(key, clip=3, hidden=64, out=2):
    """Deterministic init mimicking torch.nn.Linear default: U(-1/sqrt(fan_in), +).

    Weights use the torch (out_features, in_features) layout.
    """
    k1, k2, k3, k4 = jax.random.split(key, 4)
    bound1 = 1.0 / jnp.sqrt(jnp.float32(clip))
    bound2 = 1.0 / jnp.sqrt(jnp.float32(hidden))
    w1 = jax.random.uniform(k1, (hidden, clip), jnp.float32, -bound1, bound1)
    b1 = jax.random.uniform(k2, (hidden,), jnp.float32, -bound1, bound1)
    w2 = jax.random.uniform(k3, (out, hidden), jnp.float32, -bound2, bound2)
    b2 = jax.random.uniform(k4, (out,), jnp.float32, -bound2, bound2)
    return w1, b1, w2, b2


if __name__ == "__main__":
    key = jax.random.PRNGKey(0)
    kp, kx = jax.random.split(key)
    clip = 3
    batch = 600  # not a multiple of the tile -> exercises padded tail + multi-tile grid

    w1, b1, w2, b2 = init_params(kp, clip=clip)
    x = jax.random.normal(kx, (batch, clip), jnp.float32)

    # Multi-tile grid path (3 tiles of 256 rows) and default single-tile path.
    out_tiled = attack_forward(x, w1, b1, w2, b2, block_rows=256)
    out_default = attack_forward(x, w1, b1, w2, b2)
    out_tiled, out_default = jax.block_until_ready((out_tiled, out_default))
    assert out_tiled.shape == (batch, 2)
    assert out_default.shape == (batch, 2)

    # Ground-truth reference in float64 numpy (original module semantics).
    # fc1/bias/ReLU in the kernel are exact f32 VPU math; the only divergence is
    # MXU default-precision handling of the small f32 fc4 matmul.
    xn = np.asarray(x, dtype=np.float64)
    w1n = np.asarray(w1, dtype=np.float64)
    b1n = np.asarray(b1, dtype=np.float64)
    w2n = np.asarray(w2, dtype=np.float64)
    b2n = np.asarray(b2, dtype=np.float64)
    ref = np.maximum(xn @ w1n.T + b1n, 0.0) @ w2n.T + b2n

    assert jnp.allclose(out_tiled, ref.astype(np.float32), rtol=2e-2, atol=2e-2)
    assert jnp.allclose(out_default, ref.astype(np.float32), rtol=2e-2, atol=2e-2)
    # Tile size must not change results.
    assert jnp.allclose(out_tiled, out_default, rtol=1e-5, atol=1e-6)

    print("KERNEL_OK")
</pallas_src>

<mosaic_0001>
module attributes {stable_mosaic.version = 11 : i64} {
  func.func @attack_kernel(%arg0: i32, %arg1: memref<3x256xf32, #tpu.memory_space<vmem>>, %arg2: memref<64x3xf32, #tpu.memory_space<vmem>>, %arg3: memref<64x1xf32, #tpu.memory_space<vmem>>, %arg4: memref<2x64xf32, #tpu.memory_space<vmem>>, %arg5: memref<2x1xf32, #tpu.memory_space<vmem>>, %arg6: memref<2x256xf32, #tpu.memory_space<vmem>>) attributes {dimension_semantics = [#tpu.dimension_semantics<parallel>], iteration_bounds = array<i64: 3>, scalar_prefetch = 0 : i64, scratch_operands = 0 : i64, tpu.core_type = #tpu.core_type<tc>, window_params = [{transform_indices = @transform_0, window_bounds = array<i64: 3, 256>}, {pipeline_mode = #tpu.pipeline_mode<synchronous>, transform_indices = @transform_1, window_bounds = array<i64: 64, 3>}, {pipeline_mode = #tpu.pipeline_mode<synchronous>, transform_indices = @transform_2, window_bounds = array<i64: 64, 1>}, {pipeline_mode = #tpu.pipeline_mode<synchronous>, transform_indices = @transform_3, window_bounds = array<i64: 2, 64>}, {pipeline_mode = #tpu.pipeline_mode<synchronous>, transform_indices = @transform_4, window_bounds = array<i64: 2, 1>}, {transform_indices = @transform_5, window_bounds = array<i64: 2, 256>}]} {
    %c0 = arith.constant 0 : index
    %c0_0 = arith.constant 0 : index
    %0 = vector.load %arg1[%c0, %c0_0] : memref<3x256xf32, #tpu.memory_space<vmem>>, vector<3x256xf32>
    %c0_1 = arith.constant 0 : index
    %c0_2 = arith.constant 0 : index
    %1 = vector.load %arg2[%c0_1, %c0_2] : memref<64x3xf32, #tpu.memory_space<vmem>>, vector<64x3xf32>
    %2 = vector.extract_strided_slice %1 {offsets = [0, 0], sizes = [64, 1], strides = [1, 1]} : vector<64x3xf32> to vector<64x1xf32>
    %3 = vector.extract_strided_slice %0 {offsets = [0, 0], sizes = [1, 256], strides = [1, 1]} : vector<3x256xf32> to vector<1x256xf32>
    %4 = vector.broadcast %2 : vector<64x1xf32> to vector<64x256xf32>
    %5 = vector.broadcast %3 : vector<1x256xf32> to vector<64x256xf32>
    %6 = arith.mulf %4, %5 : vector<64x256xf32>
    %7 = vector.extract_strided_slice %1 {offsets = [0, 1], sizes = [64, 1], strides = [1, 1]} : vector<64x3xf32> to vector<64x1xf32>
    %8 = vector.extract_strided_slice %0 {offsets = [1, 0], sizes = [1, 256], strides = [1, 1]} : vector<3x256xf32> to vector<1x256xf32>
    %9 = vector.broadcast %7 : vector<64x1xf32> to vector<64x256xf32>
    %10 = vector.broadcast %8 : vector<1x256xf32> to vector<64x256xf32>
    %11 = arith.mulf %9, %10 : vector<64x256xf32>
    %12 = arith.addf %6, %11 : vector<64x256xf32>
    %13 = vector.extract_strided_slice %1 {offsets = [0, 2], sizes = [64, 1], strides = [1, 1]} : vector<64x3xf32> to vector<64x1xf32>
    %14 = vector.extract_strided_slice %0 {offsets = [2, 0], sizes = [1, 256], strides = [1, 1]} : vector<3x256xf32> to vector<1x256xf32>
    %15 = vector.broadcast %13 : vector<64x1xf32> to vector<64x256xf32>
    %16 = vector.broadcast %14 : vector<1x256xf32> to vector<64x256xf32>
    %17 = arith.mulf %15, %16 : vector<64x256xf32>
    %18 = arith.addf %12, %17 : vector<64x256xf32>
    %c0_3 = arith.constant 0 : index
    %c0_4 = arith.constant 0 : index
    %19 = vector.load %arg3[%c0_3, %c0_4] : memref<64x1xf32, #tpu.memory_space<vmem>>, vector<64x1xf32>
    %20 = vector.broadcast %19 : vector<64x1xf32> to vector<64x256xf32>
    %21 = arith.addf %18, %20 : vector<64x256xf32>
    %cst = arith.constant 0.000000e+00 : f32
    %22 = vector.broadcast %cst : f32 to vector<64x256xf32>
    %23 = arith.maximumf %21, %22 : vector<64x256xf32>
    %c0_5 = arith.constant 0 : index
    %c0_6 = arith.constant 0 : index
    %24 = vector.load %arg4[%c0_5, %c0_6] : memref<2x64xf32, #tpu.memory_space<vmem>>, vector<2x64xf32>
    %cst_7 = arith.constant dense<0.000000e+00> : vector<2x256xf32>
    %25 = tpu.matmul %24, %23, %cst_7 {dimension_numbers = #tpu.dot_dimension_numbers<[1], [0], [0], [1], [0, 0, 1, 1], [], []>} : vector<2x64xf32>, vector<64x256xf32>, vector<2x256xf32> -> vector<2x256xf32>
    %c0_8 = arith.constant 0 : index
    %c0_9 = arith.constant 0 : index
    %26 = vector.load %arg5[%c0_8, %c0_9] : memref<2x1xf32, #tpu.memory_space<vmem>>, vector<2x1xf32>
    %27 = vector.broadcast %26 : vector<2x1xf32> to vector<2x256xf32>
    %28 = arith.addf %25, %27 : vector<2x256xf32>
    %c0_10 = arith.constant 0 : index
    %c0_11 = arith.constant 0 : index
    %29 = vector.load %arg6[%c0_10, %c0_11] : memref<2x256xf32, #tpu.memory_space<vmem>>, vector<2x256xf32>
    tpu.vector_store %arg6[%c0_10, %c0_11], %28 {strides = array<i32>} : memref<2x256xf32, #tpu.memory_space<vmem>>, vector<2x256xf32>,
    return
  }
  func.func @transform_0(%arg0: i32) -> (i32, i32) {
    %c0_i32 = arith.constant 0 : i32
    %c0_i32_0 = arith.constant 0 : i32
    return %c0_i32, %arg0 : i32, i32
  }
  func.func @transform_1(%arg0: i32) -> (i32, i32) {
    %c0_i32 = arith.constant 0 : i32
    %c0_i32_0 = arith.constant 0 : i32
    %c0_i32_1 = arith.constant 0 : i32
    return %c0_i32, %c0_i32_0 : i32, i32
  }
  func.func @transform_2(%arg0: i32) -> (i32, i32) {
    %c0_i32 = arith.constant 0 : i32
    %c0_i32_0 = arith.constant 0 : i32
    %c0_i32_1 = arith.constant 0 : i32
    return %c0_i32, %c0_i32_0 : i32, i32
  }
  func.func @transform_3(%arg0: i32) -> (i32, i32) {
    %c0_i32 = arith.constant 0 : i32
    %c0_i32_0 = arith.constant 0 : i32
    %c0_i32_1 = arith.constant 0 : i32
    return %c0_i32, %c0_i32_0 : i32, i32
  }
  func.func @transform_4(%arg0: i32) -> (i32, i32) {
    %c0_i32 = arith.constant 0 : i32
    %c0_i32_0 = arith.constant 0 : i32
    %c0_i32_1 = arith.constant 0 : i32
    return %c0_i32, %c0_i32_0 : i32, i32
  }
  func.func @transform_5(%arg0: i32) -> (i32, i32) {
    %c0_i32 = arith.constant 0 : i32
    %c0_i32_0 = arith.constant 0 : i32
    return %c0_i32, %arg0 : i32, i32
  }
}

</mosaic_0001>

<bundles_post_ra>
// kernel: tpu_custom_call.1
= control target key start
LH: loop header
LB: loop body
LE: loop exit
PB: predicated region body
PF: predicated region fallthrough
CT: control target
= control target key end

     0   :  { %10 = vsyncpa [#allocation3], 0  ;;  %s1143_s0 = inlined_call_operand.vmem [shape: f32[3,768], index: 0, kind: input, shape index: {}]   ;;  %s1144_s1 = inlined_call_operand.vmem [shape: f32[64,3], index: 1, kind: input, shape index: {}]   ;;  %s1145_s2 = inlined_call_operand.vmem [shape: f32[64,1], index: 2, kind: input, shape index: {}]   ;;  %s1146_s3 = inlined_call_operand.vmem [shape: f32[2,64], index: 3, kind: input, shape index: {}]   ;;  %s1147_s4 = inlined_call_operand.vmem [shape: f32[2,1], index: 4, kind: input, shape index: {}]   ;;  %s1148_s5 = inlined_call_operand.hbm [shape: f32[2,768], index: 5, kind: output, shape index: {}]  }
   0x1   :  { %12 = vsyncpa [#allocation3 + $0x1], 0  ;;  %s910_s18 = smov 0   ;;  %s912_s19 = smov 0  }
   0x2   :  { %s914_s20 = smov 0   ;;  %s916_s21 = smov 0  }
   0x3 LB: > { %s931_s22 = sadd.s32 4294967295, %s873_s21   ;;  %s722_s23 = sadd.s32 4294967294, %s873_s21   ;;  %s873_s21 = sphi %s916_s21, %s1154_s21   ;;  %s869_s20 = sphi %s914_s20, %s1153_s20   ;;  %s865_s19 = sphi %s912_s19, %s1152_s19   ;;  %s861_s18 = sphi %s910_s18, %s1151_s18  }
   0x4   : > { %s935_s24 = sadd.s32 1, %s873_s21   ;;  %s135_s25 = sadd.s32 1, %s869_s20 }
   0x5   : > { %s132_s26 = ssub.s32 %s873_s21, %s935_s24  ;;  %p145_p0 = scmp.ne.s32.totalorder %s869_s20, %s865_s19 }
   0x6   : > { %p133_p1 = scmp.eq.s32.totalorder %s132_s26, 0  ;;  %p146_p2 = scmp.eq.s32.totalorder %s931_s22, 2 }
   0x7   : > { %p151_p3 = scmp.ne.s32.totalorder %s865_s19, %s861_s18  ;;  %p152_p4 = scmp.eq.s32.totalorder %s722_s23, 2 }
   0x8   : > { %s946_s27 = scalar_select %p133_p1, %s869_s20, %s135_s25  }
   0x9   : > { %p948_p5 = por %p146_p2, %p145_p0  ;;  %p952_p6 = por %p152_p4, %p151_p3 }
   0xa   : > { %p725_p7 = scmp.ge.s32.totalorder %s873_s21, 1  ;;  %p191_p8 = scmp.lt.s32.totalorder %s873_s21, 4 }
   0xc   : > { %p192_p9 = pnand %p725_p7, %p191_p8 }
   0xd   : > { %v227_v0 = vld [vmem:[%s1144_s1] sm:$0xff] (!%p192_p9)  ;;  %v875_v1 = vmov (!%p192_p9), 2   ;;  %v876_v2 = vmov (!%p192_p9), 1   ;;  %v229_v3 = vld [vmem:[%s1144_s1 + $0x10] sm:$0xff] (!%p192_p9)  ;;  %v228_v4 = vld [vmem:[%s1144_s1 + $0x8] sm:$0xff] (!%p192_p9)  ;;  %v877_v7 = vmov (!%p192_p9), 0   ;;  %v276_v25 = vlaneseq (!%p192_p9) }
   0xe   : > { %195 = sbr.rel (%p192_p9) target bundleno = 471 (0x1d7), region = 40  ;;  %797 = vset.pattern.permute.xlu0 (!%p192_p9), %v875_v1  ;;  %796 = vset.pattern.permute.xlu1 (!%p192_p9), %v876_v2  ;;  %v232_v5 = vld [vmem:[%s1144_s1 + $0x28] sm:$0xff] (!%p192_p9)  ;;  %v231_v6 = vld [vmem:[%s1144_s1 + $0x20] sm:$0xff] (!%p192_p9)  ;;  %v234_v8 = vld [vmem:[%s1144_s1 + $0x38] sm:$0xff] (!%p192_p9)  ;;  %v878_v20 = vmov (!%p192_p9), 0.0   ;;  %s727_s7 = sshll.u32 (!%p192_p9), %s931_s22, 1 }
   0xf   : > { %393 = vperm.xlu0 (!%p192_p9), %797, %v227_v0   ;;  %311 = vperm.xlu1 (!%p192_p9), %796, %v227_v0   ;;  %v230_v9 = vld [vmem:[%s1144_s1 + $0x18] sm:$0xff] (!%p192_p9)  ;;  %v474_v10 = vld [vmem:[%s1145_s2] sm:$0xff] (!%p192_p9)  ;;  %v475_v11 = vld [vmem:[%s1145_s2 + $0x8] sm:$0xff] (!%p192_p9)  ;;  %p220_p10 = scmp.lt.s32.totalorder (!%p192_p9), %s727_s7, 5  ;;  %v277_v28 = vshrl.u32 (!%p192_p9), %v276_v25, 7  ;;  %vm561_vm0 = vcmask (!%p192_p9), 523264  }
  0x10   : > { %v233_v12 = vld [vmem:[%s1144_s1 + $0x30] sm:$0xff] (!%p192_p9)  ;;  %v478_v13 = vld [vmem:[%s1145_s2 + $0x20] sm:$0xff] (!%p192_p9)  ;;  %v481_v14 = vld [vmem:[%s1145_s2 + $0x38] sm:$0xff] (!%p192_p9)  ;;  %629 = vmatprep.mubr.f32.mxu0 (!%p192_p9), %v878_v20  ;;  %s216_s14 = sand.u32 (!%p192_p9), 1, %s865_s19   ;;  %s736_s16 = sshll.u32 (!%p192_p9), %s931_s22, 6 }
  0x11   : > { %v476_v15 = vld [vmem:[%s1145_s2 + $0x10] sm:$0xff] (!%p192_p9)  ;;  %v477_v16 = vld [vmem:[%s1145_s2 + $0x18] sm:$0xff] (!%p192_p9)  ;;  %v479_v17 = vld [vmem:[%s1145_s2 + $0x28] sm:$0xff] (!%p192_p9)  ;;  %v344_v30 = vsub.s32 (!%p192_p9), 1, %v277_v28  ;;  %v348_v31 = vsub.s32 (!%p192_p9), 5, %v277_v28  ;;  %v278_v32 = vsub.s32 (!%p192_p9), 0, %v277_v28  ;;  %s1101_s30 = scalar_lea.hbm (!%p192_p9), %s1148_s5, %s736_s16 }
  0x12   : > { %v480_v18 = vld [vmem:[%s1145_s2 + $0x30] sm:$0xff] (!%p192_p9)  ;;  %v555_v19 = vld [vmem:[%s1147_s4] sm:$0x3] (!%p192_p9)  ;;  %v282_v33 = vsub.s32 (!%p192_p9), 4, %v277_v28  ;;  %v426_v36 = vsub.s32 (!%p192_p9), 2, %v277_v28  ;;  %v430_v37 = vsub.s32 (!%p192_p9), 6, %v277_v28 }
  0x13   : > { %401 = vperm.xlu0 (!%p192_p9), %797, %v229_v3   ;;  %315 = vperm.xlu1 (!%p192_p9), %796, %v228_v4   ;;  %s726_s15 = sshll.u32 (!%p192_p9), %s216_s14, 2  ;;  %s649_s6 = scalar_lea.sflag (!%p192_p9), [#allocation3], %s216_s14 }
  0x14   : > { %s218_s17 = scalar_lea.vmem (!%p192_p9), [#allocation2], %s726_s15  ;;  %s879_s22 = smov (!%p192_p9), [#allocation2]  }
  0x15   : > { %s1156_s7 = smov (!%p220_p10, %s727_s7), 5  ;;  %s663_s23 = sshll.u32 %s218_s17, 4  ;;  %s1103_s23 = int_to_ptr.vmem [resolvable:$true] %s663_s23 }
  0x16   : > { %s728_s8 = sshll.u32 %s1156_s7, 2  ;;  %s811_s7 = scalar_lea.vmem %s1103_s23, 64 }
  0x17   : > { %413 = vperm.xlu0 %797, %v232_v5   ;;  %798 = vset.pattern.permute.xlu1 %v875_v1  ;;  %s223_s11 = scalar_lea.vmem %s1143_s0, %s728_s8  ;;  %p812_p11 = scmp.ne.s32.totalorder %s1103_s23, %s811_s7 }
  0x18   : > { %397 = vperm.xlu1 %798, %v228_v4   ;;  %v226_v35 = vld [vmem:[%s223_s11] sm:$0x77]  ;;  %s815_s8 = sshll.u32 %s879_s22, 4  ;;  %s816_s8 = int_to_ptr.vmem [resolvable:$false] %s815_s8 }
  0x19   : > { %v345_v39 = vrot.slane %v226_v35, %v344_v30  ;;  %v349_v40 = vrot.slane %v226_v35, %v348_v31  ;;  %v279_v41 = vrot.slane %v226_v35, %v278_v32  ;;  %v283_v42 = vrot.slane %v226_v35, %v282_v33  ;;  %p813_p12 = pnand %p812_p11, %p948_p5  ;;  %s817_s9 = scalar_lea.vmem %s816_s8, 128 }
  0x1a   : > { %v427_v44 = vrot.slane %v226_v35, %v426_v36  ;;  %v431_v45 = vrot.slane %v226_v35, %v430_v37  ;;  %p818_p0 = scmp.lt.s32.totalorder %s1103_s23, %s816_s8  ;;  %p819_p1 = scmp.lt.s32.totalorder %s817_s9, %s811_s7 }
  0x1b   : > { %805 = vset.pattern.permute.xlu0 %v876_v2  ;;  %v1023_v46 = vrot.slane %v345_v39, %v344_v30  ;;  %v1025_v47 = vrot.slane %v349_v40, %v344_v30  ;;  %v1027_v48 = vrot.slane %v279_v41, %v278_v32  ;;  %v1029_v49 = vrot.slane %v283_v42, %v278_v32  ;;  %p814_p13 = pneg %p813_p12 }
  0x1c   : > { %327 = vperm.xlu0 %805, %v231_v6   ;;  %799 = vset.pattern.permute.xlu1 %v877_v7  ;;  %v1035_v56 = vrot.slane %v427_v44, %v426_v36  ;;  %v1037_v57 = vrot.slane %v431_v45, %v426_v36  ;;  %p820_p2 = por %p819_p1, %p818_p0 }
  0x1d   : > { %247 = vperm.xlu1 %799, %v229_v3  }
  0x1e   : > { %p821_p3 = pnand %p820_p2, %p814_p13 }
  0x20   : > { %339 = vperm.xlu0 %805, %v234_v8  }
  0x21   : > { %800 = vset.pattern.permute.xlu1 %v876_v2 }
  0x22   : > { %319 = vperm.xlu1 %800, %v229_v3  }
  0x24   : > { %808 = vset.pattern.permute.xlu0 %v877_v7 }
  0x25   : > { %237 = vperm.xlu0 %808, %v227_v0  }
  0x26   : > { %323 = vperm.xlu1 %800, %v230_v9  }
  0x29   : > { %242 = vperm.xlu0 %808, %v228_v4  }
  0x2a   : > { %801 = vset.pattern.permute.xlu1 %v875_v1 }
  0x2b   : > { %405 = vperm.xlu1 %801, %v230_v9  }
  0x2d   : > { %252 = vperm.xlu0 %808, %v230_v9  }
  0x2f   : > { %802 = vset.pattern.permute.xlu1 %v877_v7 }
  0x30   : > { %484 = vperm.xlu1 %802, %v474_v10  }
  0x31   : > { %489 = vperm.xlu0 %808, %v475_v11  }
  0x34   : > { %257 = vperm.xlu1 %802, %v231_v6  }
  0x35   : > { %267 = vperm.xlu0 %808, %v233_v12  }
  0x38   : > { %262 = vperm.xlu1 %802, %v232_v5  }
  0x39   : > { %504 = vperm.xlu0 %808, %v478_v13  }
  0x3c   : > { %803 = vset.pattern.permute.xlu1 %v876_v2 }
  0x3d   : > { %331 = vperm.xlu1 %803, %v232_v5   ;;  %519 = vperm.xlu0 %808, %v481_v14  }
  0x41   : > { %804 = vset.pattern.permute.xlu1 %v875_v1 }
  0x42   : > { %409 = vperm.xlu1 %804, %v231_v6  }
  0x46   : > { %806 = vset.pattern.permute.xlu1 %v877_v7 }
  0x47   : > { %494 = vperm.xlu1 %806, %v476_v15  }
  0x4b   : > { %499 = vperm.xlu1 %806, %v477_v16  }
  0x4f   : > { %272 = vperm.xlu1 %806, %v234_v8  }
  0x53   : > { %807 = vset.pattern.permute.xlu1 %v876_v2 }
  0x54   : > { %335 = vperm.xlu1 %807, %v233_v12  }
  0x58   : > { %809 = vset.pattern.permute.xlu1 %v875_v1 }
  0x59   : > { %417 = vperm.xlu1 %809, %v233_v12  }
  0x5d   : > { %421 = vperm.xlu1 %809, %v234_v8  }
  0x61   : > { %810 = vset.pattern.permute.xlu1 %v877_v7 }
  0x62   : > { %509 = vperm.xlu1 %810, %v479_v17  }
  0x66   : > { %514 = vperm.xlu1 %810, %v480_v18  }
  0x6a   : > { %558 = vperm.xlu1 %810, %v555_v19  }
  0x8e   : > { %v312_v21 = vpop.permute.xlu1 %311  ;;  %v394_v22 = vpop.permute.xlu0 %393 }
  0x8f   : > { %v360_v54 = vmul.f32 %v1023_v46, %v312_v21  ;;  %v361_v55 = vmul.f32 %v1025_v47, %v312_v21  ;;  %v442_v63 = vmul.f32 %v1035_v56, %v394_v22  ;;  %v443_v0 = vmul.f32 %v1037_v57, %v394_v22 }
  0x92   : > { %v316_v23 = vpop.permute.xlu1 %315  ;;  %v1010_v24 = vpop.permute.xlu0 %401 }
  0x93   : > { %v362_v59 = vmul.f32 %v1023_v46, %v316_v23  ;;  %v363_v60 = vmul.f32 %v1025_v47, %v316_v23  ;;  %v446_v40 = vmul.f32 %v1035_v56, %v1010_v24  ;;  %v447_v41 = vmul.f32 %v1037_v57, %v1010_v24 }
  0x96   : > { %v1012_v26 = vpop.permute.xlu0 %413 }
  0x97   : > { %v398_v27 = vpop.permute.xlu1 %397 }
  0x98   : > { %v444_v7 = vmul.f32 %v1035_v56, %v398_v27  ;;  %v445_v8 = vmul.f32 %v1037_v57, %v398_v27 }
  0x9b   : > { %v1017_v29 = vpop.permute.xlu0 %327 }
  0x9c   : > { %v1019_v34 = vpop.permute.xlu1 %247 }
  0x9d   : > { %v298_v33 = vmul.f32 %v1027_v48, %v1019_v34  ;;  %v299_v35 = vmul.f32 %v1029_v49, %v1019_v34 }
  0x9f   : > { %v1021_v38 = vpop.permute.xlu0 %339 }
  0xa1   : > { %v320_v43 = vpop.permute.xlu1 %319 }
  0xa2   : > { %v364_v31 = vmul.f32 %v1023_v46, %v320_v43  ;;  %v365_v32 = vmul.f32 %v1025_v47, %v320_v43 }
  0xa4   : > { %v238_v50 = vpop.permute.xlu0 %237  ;;  %v380_v42 = vadd.f32 %v364_v31, %v298_v33  ;;  %v381_v44 = vadd.f32 %v365_v32, %v299_v35  ;;  %v375_v32 = vmul.f32 %v1025_v47, %v1021_v38 }
  0xa5   : > { %v324_v51 = vpop.permute.xlu1 %323  ;;  %v294_v52 = vmul.f32 %v1027_v48, %v238_v50  ;;  %v295_v53 = vmul.f32 %v1029_v49, %v238_v50 }
  0xa6   : > { %v366_v43 = vmul.f32 %v1023_v46, %v324_v51  ;;  %v367_v45 = vmul.f32 %v1025_v47, %v324_v51 }
  0xa7   : > { %v376_v1 = vadd.f32 %v360_v54, %v294_v52  ;;  %v377_v2 = vadd.f32 %v361_v55, %v295_v53  ;;  %v462_v55 = vadd.f32 %v446_v40, %v380_v42 }
  0xa8   : > { %v243_v58 = vpop.permute.xlu0 %242 }
  0xa9   : > { %v296_v61 = vmul.f32 %v1027_v48, %v243_v58  ;;  %v297_v62 = vmul.f32 %v1029_v49, %v243_v58  ;;  %v458_v9 = vadd.f32 %v442_v63, %v376_v1  ;;  %v459_v10 = vadd.f32 %v443_v0, %v377_v2 }
  0xaa   : > { %v406_v3 = vpop.permute.xlu1 %405  ;;  %v463_v58 = vadd.f32 %v447_v41, %v381_v44 }
  0xab   : > { %v378_v4 = vadd.f32 %v362_v59, %v296_v61  ;;  %v379_v5 = vadd.f32 %v363_v60, %v297_v62  ;;  %v448_v53 = vmul.f32 %v1035_v56, %v406_v3  ;;  %v449_v54 = vmul.f32 %v1037_v57, %v406_v3 }
  0xac   : > { %v253_v6 = vpop.permute.xlu0 %252  ;;  %v368_v3 = vmul.f32 %v1023_v46, %v1017_v29 }
  0xad   : > { %v460_v12 = vadd.f32 %v444_v7, %v378_v4  ;;  %v461_v13 = vadd.f32 %v445_v8, %v379_v5  ;;  %v300_v36 = vmul.f32 %v1027_v48, %v253_v6  ;;  %v301_v37 = vmul.f32 %v1029_v49, %v253_v6 }
  0xaf   : > { %v485_v11 = vpop.permute.xlu1 %484  ;;  %v382_v50 = vadd.f32 %v366_v43, %v300_v36  ;;  %v383_v52 = vadd.f32 %v367_v45, %v301_v37 }
  0xb0   : > { %v522_v14 = vadd.f32 %v485_v11, %v458_v9  ;;  %v523_v15 = vadd.f32 %v485_v11, %v459_v10  ;;  %v490_v16 = vpop.permute.xlu0 %489  ;;  %v369_v9 = vmul.f32 %v1025_v47, %v1017_v29 }
  0xb1   : > { %v524_v17 = vadd.f32 %v490_v16, %v460_v12  ;;  %v525_v18 = vadd.f32 %v490_v16, %v461_v13  ;;  %v464_v61 = vadd.f32 %v448_v53, %v382_v50  ;;  %v465_v62 = vadd.f32 %v449_v54, %v383_v52 }
  0xb2   : > { %v538_v19 = vmax.f32 %v522_v14, 0.0  ;;  %v539_v20 = vmax.f32 %v523_v15, 0.0 }
  0xb3   : > { %v540_v21 = vmax.f32 %v524_v17, 0.0  ;;  %v258_v22 = vpop.permute.xlu1 %257  ;;  %v541_v23 = vmax.f32 %v525_v18, 0.0 }
  0xb4   : > { %v302_v10 = vmul.f32 %v1027_v48, %v258_v22  ;;  %v303_v11 = vmul.f32 %v1029_v49, %v258_v22  ;;  %v268_v12 = vpop.permute.xlu0 %267 }
  0xb5   : > { %v737_v25 = vpack.c.bf16 %v541_v23, %v539_v20  ;;  %v739_v28 = vpack.c.bf16 %v540_v21, %v538_v19  ;;  %v452_v23 = vmul.f32 %v1035_v56, %v1012_v26  ;;  %v306_v41 = vmul.f32 %v1027_v48, %v268_v12 }
  0xb6   : > { %v384_v18 = vadd.f32 %v368_v3, %v302_v10  ;;  %v385_v19 = vadd.f32 %v369_v9, %v303_v11  ;;  %v307_v42 = vmul.f32 %v1029_v49, %v268_v12  ;;  %v554_v11 = vld [vmem:[%s1146_s3] sm:$0x3] }
  0xb7   : > { %v263_v30 = vpop.permute.xlu1 %262  ;;  %738 = vmatprep.subr.bf16.mxu0 %v737_v25  ;;  %v453_v25 = vmul.f32 %v1037_v57, %v1012_v26 }
  0xb8   : > { %740 = vmatpush1.bf16.msra.mxu0 %v739_v28  ;;  %v304_v20 = vmul.f32 %v1027_v48, %v263_v30  ;;  %v305_v29 = vmul.f32 %v1029_v49, %v263_v30  ;;  %v505_v35 = vpop.permute.xlu0 %504 }
  0xbc   : > { %v332_v27 = vpop.permute.xlu1 %331 }
  0xbd   : > { %v370_v15 = vmul.f32 %v1023_v46, %v332_v27  ;;  %v371_v16 = vmul.f32 %v1025_v47, %v332_v27  ;;  %v374_v27 = vmul.f32 %v1023_v46, %v1021_v38 }
  0xbf   : > { %v386_v33 = vadd.f32 %v370_v15, %v304_v20  ;;  %v387_v30 = vadd.f32 %v371_v16, %v305_v29 }
  0xc1   : > { %v410_v39 = vpop.permute.xlu1 %409  ;;  %v468_v53 = vadd.f32 %v452_v23, %v386_v33 }
  0xc2   : > { %v450_v13 = vmul.f32 %v1035_v56, %v410_v39  ;;  %v451_v14 = vmul.f32 %v1037_v57, %v410_v39 }
  0xc4   : > { %v466_v28 = vadd.f32 %v450_v13, %v384_v18  ;;  %v467_v31 = vadd.f32 %v451_v14, %v385_v19 }
  0xc6   : > { %v495_v34 = vpop.permute.xlu1 %494  ;;  %v530_v45 = vadd.f32 %v505_v35, %v466_v28  ;;  %v531_v38 = vadd.f32 %v505_v35, %v467_v31 }
  0xc7   : > { %v526_v59 = vadd.f32 %v495_v34, %v462_v55  ;;  %v527_v60 = vadd.f32 %v495_v34, %v463_v58 }
  0xc9   : > { %v542_v1 = vmax.f32 %v526_v59, 0.0  ;;  %v543_v2 = vmax.f32 %v527_v60, 0.0 }
  0xca   : > { %v500_v24 = vpop.permute.xlu1 %499 }
  0xcb   : > { %v528_v63 = vadd.f32 %v500_v24, %v464_v61  ;;  %v529_v0 = vadd.f32 %v500_v24, %v465_v62  ;;  %v547_v61 = vmax.f32 %v531_v38, 0.0 }
  0xcd   : > { %v544_v4 = vmax.f32 %v528_v63, 0.0  ;;  %v545_v51 = vmax.f32 %v529_v0, 0.0 }
  0xce   : > { %v273_v5 = vpop.permute.xlu1 %272 }
  0xcf   : > { %v741_v6 = vpack.c.bf16 %v545_v51, %v543_v2  ;;  %v743_v7 = vpack.c.bf16 %v544_v4, %v542_v1  ;;  %v308_v21 = vmul.f32 %v1027_v48, %v273_v5  ;;  %v309_v22 = vmul.f32 %v1029_v49, %v273_v5  ;;  %v520_v49 = vpop.permute.xlu0 %519 }
  0xd0   : > { %v546_v48 = vmax.f32 %v530_v45, 0.0 }
  0xd1   : > { %742 = vmatprep.subr.bf16.mxu0 %v741_v6  ;;  %v390_v44 = vadd.f32 %v374_v27, %v308_v21  ;;  %v391_v43 = vadd.f32 %v375_v32, %v309_v22 }
  0xd2   : > { %744 = vmatpush1.bf16.msra.mxu0 %v743_v7 }
  0xd3   : > { %v336_v8 = vpop.permute.xlu1 %335 }
  0xd4   : > { %v372_v37 = vmul.f32 %v1023_v46, %v336_v8  ;;  %v373_v39 = vmul.f32 %v1025_v47, %v336_v8  ;;  %v469_v47 = vadd.f32 %v453_v25, %v387_v30 }
  0xd6   : > { %v388_v54 = vadd.f32 %v372_v37, %v306_v41  ;;  %v389_v55 = vadd.f32 %v373_v39, %v307_v42 }
  0xd8   : > { %v418_v17 = vpop.permute.xlu1 %417 }
  0xd9   : > { %v454_v50 = vmul.f32 %v1035_v56, %v418_v17  ;;  %v455_v52 = vmul.f32 %v1037_v57, %v418_v17 }
  0xdb   : > { %v470_v62 = vadd.f32 %v454_v50, %v388_v54  ;;  %v471_v24 = vadd.f32 %v455_v52, %v389_v55 }
  0xdc   : > { %v422_v36 = vpop.permute.xlu1 %421 }
  0xdd   : > { %v456_v40 = vmul.f32 %v1035_v56, %v422_v36  ;;  %v457_v26 = vmul.f32 %v1037_v57, %v422_v36 }
  0xdf   : > { %v472_v34 = vadd.f32 %v456_v40, %v390_v44  ;;  %v473_v46 = vadd.f32 %v457_v26, %v391_v43 }
  0xe1   : > { %v510_v58 = vpop.permute.xlu1 %509  ;;  %v536_v63 = vadd.f32 %v520_v49, %v472_v34  ;;  %v537_v0 = vadd.f32 %v520_v49, %v473_v46 }
  0xe2   : > { %v532_v59 = vadd.f32 %v510_v58, %v468_v53  ;;  %v533_v60 = vadd.f32 %v510_v58, %v469_v47 }
  0xe3   : > { %v553_v8 = vmax.f32 %v537_v0, 0.0  ;;  %v552_v3 = vmax.f32 %v536_v63, 0.0 }
  0xe4   : > { %v548_v1 = vmax.f32 %v532_v59, 0.0  ;;  %v549_v56 = vmax.f32 %v533_v60, 0.0 }
  0xe5   : > { %v515_v2 = vpop.permute.xlu1 %514 }
  0xe6   : > { %v534_v57 = vadd.f32 %v515_v2, %v470_v62  ;;  %v535_v4 = vadd.f32 %v515_v2, %v471_v24  ;;  %v745_v51 = vpack.c.bf16 %v549_v56, %v547_v61  ;;  %v747_v5 = vpack.c.bf16 %v548_v1, %v546_v48 }
  0xe8   : > { %v550_v6 = vmax.f32 %v534_v57, 0.0  ;;  %v551_v7 = vmax.f32 %v535_v4, 0.0  ;;  %746 = vmatprep.subr.bf16.mxu0 %v745_v51 }
  0xe9   : > { %748 = vmatpush1.bf16.msra.mxu0 %v747_v5  ;;  %v559_v12 = vpop.permute.xlu1 %558 }
  0xea   : > { %v749_v9 = vpack.c.bf16 %v553_v8, %v551_v7  ;;  %v751_v10 = vpack.c.bf16 %v552_v3, %v550_v6 }
  0xec   : > { %750 = vmatprep.subr.bf16.mxu0 %v749_v9 }
  0xed   : > { %752 = vmatpush1.bf16.msra.mxu0 %v751_v10 }
  0xf0   : > { %729 = vmatmul.mubr.msk.f32.vlgmr.msra.gmra.mrb[0].mxu0 %vm561_vm0, %v554_v11 }
 0x1c3   : > { %v631_v13 = vpop.f32.mrb[0].mxu0 }
 0x1c4   : > { %v632_v14 = vadd.f32 %v631_v13, %v559_v12  ;;  %v633_v15 = vpop.f32.mrb[1].mxu0 }
 0x1c5   : > { %v634_v16 = vadd.f32 %v633_v15, %v559_v12 }
 0x1c7   : > { %v638_v17 = vcombine.low %v632_v14, %v634_v16 }
 0x1c9   : > { %730 = vst.sshfl [vmem:[%s218_s17] sm:$0x33 pattern:$0x76325410] %v638_v17 }
 0x1ca   : > { %824 = shalt.err (!%p821_p3)
}
 0x1cb   : > { %s825_s10 = scalar_lea.hbm %s1101_s30, 64  ;;  %s829_s13 = scalar_lea.hbm %s1148_s5, 192 }
 0x1cc   : > { %p826_p4 = scmp.ne.s32.totalorder %s1101_s30, %s825_s10  ;;  %p830_p9 = scmp.lt.u32.totalorder %s1101_s30, %s1148_s5 }
 0x1cd   : > { %p831_p10 = scmp.lt.u32.totalorder %s829_s13, %s825_s10  ;;  %p833_p12 = scmp.lt.u32.totalorder %s825_s10, %s1101_s30 }
 0x1ce   : > { %p827_p7 = pnand %p826_p4, %p948_p5 }
 0x1cf   : > { %p832_p11 = por %p831_p10, %p830_p9 }
 0x1d0   : > { %p828_p8 = pneg %p827_p7 }
 0x1d1   : > { %p834_p13 = por %p833_p12, %p832_p11 }
 0x1d3   : > { %p835_p0 = pnand %p834_p13, %p828_p8 }
 0x1d5   : > { %838 = shalt.err (!%p835_p0)
}
 0x1d6   : > { %753 = dma.vmem_to_hbm [thread:$0]  (%p948_p5), %s1103_s23, 64, %s1101_s30, %s649_s6  }
 0x1d7 PF: > { %p759_p1 = scmp.ge.s32.totalorder %s873_s21, 2  ;;  %s675_s16 = sand.u32 1, %s861_s18  }
 0x1d8   : > { %s676_s17 = scalar_lea.sflag [#allocation3], %s675_s16 }
 0x1d9   : > { %p756_p2 = pnand %p759_p1, %p952_p6 }
 0x1db   : > { %856 = dma.done.wait (!%p756_p2), %s676_s17, 64  }
 0x1dc   : > { %858 = vsyncadd (!%p756_p2), %s676_s17, 4294967232  ;;  %p15_p3 = scmp.ge.s32.totalorder %s935_s24, 5   ;;  %s1151_s18 = smov %s865_s19 }
 0x1dd   : > { %s1152_s19 = smov %s869_s20  ;;  %s1153_s20 = smov %s946_s27 }
 0x1de   : > { %s1154_s21 = smov %s935_s24  ;;  %17 = sbr.rel (!%p15_p3) target bundleno = 3 (0x3), region = 75 }
 0x1e5   :  { %681 = vsyncpa [#allocation3], 1 }
 0x1e6   :  { %683 = vsyncpa [#allocation3 + $0x1], 1 }

</bundles_post_ra>
